<compile_context>
chip_gen: v7x
topology: tpu7x:2x2x1
jax: 0.10.0
libtpu: 0.0.40
codegen_flags: <defaults>
</compile_context>

<pallas_src>
import functools
import math

import jax
import jax.numpy as jnp
from jax.experimental import pallas as pl
from jax.experimental.pallas import tpu as pltpu


def _stats_kernel(x_ref, y_ref, out_ref, acc_ref, *, loss_1_type, beta):
    """Grid = (shards, Kc).  Accumulates six per-row stat slabs in VMEM and
    reduces/packs/stores them only on the last reduction step.

    acc_ref slabs (each (rows, tn), f32):
      0: elementwise loss_1 term    1: x      2: y
      3: x*x                        4: y*y    5: x*y
    out_ref block: (1, 8, rows) -- rows 0..5 hold the per-row sums.
    """
    k = pl.program_id(1)

    @pl.when(k == 0)
    def _init():
        acc_ref[...] = jnp.zeros_like(acc_ref)

    x = x_ref[...].astype(jnp.float32)
    y = y_ref[...].astype(jnp.float32)
    d = x - y

    if loss_1_type == "l1":
        e = jnp.abs(d)
    elif loss_1_type == "l2":
        e = d * d
    else:  # smooth_l1
        ad = jnp.abs(d)
        e = jnp.where(ad < beta, (0.5 / beta) * (d * d), ad - 0.5 * beta)

    # Pure VALU accumulation; no cross-lane work in the steady state.
    acc_ref[0, :, :] += e
    acc_ref[1, :, :] += x
    acc_ref[2, :, :] += y
    acc_ref[3, :, :] += x * x
    acc_ref[4, :, :] += y * y
    acc_ref[5, :, :] += x * y

    @pl.when(k == pl.num_programs(1) - 1)
    def _epilogue():
        sums = jnp.sum(acc_ref[...], axis=2)                    # (6, rows)
        pad = jnp.zeros((2, sums.shape[1]), jnp.float32)
        out_ref[0, :, :] = jnp.concatenate([sums, pad], axis=0)  # (8, rows)


def composite_loss(x, y, *, loss_1_type="l1", cc_weight=0.1, beta=0.05,
                   target_tn=2048, max_rows=128):
    """JAX / Pallas equivalent of Composite_Loss.forward(input, target).

    x, y: (B, C, H, W) arrays (NCHW, any float dtype).
    Returns (loss_1, cc, loss) as float32 scalars.
    """
    assert loss_1_type in ("l1", "l2", "smooth_l1")
    B, C, H, W = x.shape
    N = C * H * W

    # ---- sublane folding: rows = B * R, a multiple of 8 -------------------
    R = 8 // math.gcd(B, 8)
    while (B * R * 2 <= max_rows) and (-(-N // (R * 2)) >= 256):
        R *= 2
    rows = B * R
    L = -(-N // R)                                   # per-row length (ceil)

    # ---- lane tiling: tn multiple of 128, sized to the hardware -----------
    L128 = -(-L // 128) * 128
    tn = max(128, (min(target_tn, L128) // 128) * 128)
    # keep rows*tn bounded so 6 f32 scratch slabs + double-buffered inputs
    # stay well inside the scoped-VMEM default on every generation (incl. v7x).
    while rows * tn > 256 * 1024 and tn > 128:
        tn //= 2

    K = -(-L128 // tn)
    shards = 2 if K >= 2 else 1                      # 2-TC split on v7x
    K = -(-K // shards) * shards
    Kc = K // shards
    Lp = K * tn

    # ---- layout: (B, N) -> zero-pad -> (rows, Lp); padded zeros contribute
    # nothing to any sum (and d = 0 for all three loss types). --------------
    xf = x.reshape(B, N)
    yf = y.reshape(B, N)
    pad_amt = R * Lp - N
    if pad_amt:
        # TODO(synk): in-kernel tail masking would avoid this extra HBM copy
        # for ragged N; zero-padding is correct but costs one pass.
        xf = jnp.pad(xf, ((0, 0), (0, pad_amt)))
        yf = jnp.pad(yf, ((0, 0), (0, pad_amt)))
    x2 = xf.reshape(rows, Lp)                        # original dtype, no upcast
    y2 = yf.reshape(rows, Lp)

    kernel = functools.partial(_stats_kernel, loss_1_type=loss_1_type, beta=beta)

    partials = pl.pallas_call(
        kernel,
        out_shape=jax.ShapeDtypeStruct((shards, 8, rows), jnp.float32),
        grid=(shards, Kc),
        in_specs=[
            pl.BlockSpec((rows, tn), lambda i, k: (0, i * Kc + k)),
            pl.BlockSpec((rows, tn), lambda i, k: (0, i * Kc + k)),
        ],
        out_specs=pl.BlockSpec((1, 8, rows), lambda i, k: (i, 0, 0)),
        scratch_shapes=[pltpu.VMEM((6, rows, tn), jnp.float32)],
        compiler_params=pltpu.CompilerParams(
            dimension_semantics=("parallel", "arbitrary"),
        ),
    )(x2, y2)

    # ---- scalar epilogue in plain JAX --------------------------------------
    stats = jnp.sum(partials, axis=0)                # (8, rows)
    per_batch = stats.reshape(8, B, R).sum(axis=2)   # (8, B)
    s_e, s_x, s_y, s_xx, s_yy, s_xy = (per_batch[i] for i in range(6))

    n = jnp.float32(N)
    total = jnp.float32(B * N)

    loss_1 = jnp.sum(s_e) / total

    if C == 1:
        # torch: squeeze(dim=1) -> (B, H, W); stats pooled over ALL elements.
        gm_x = jnp.sum(s_x) / total
        gm_y = jnp.sum(s_y) / total
        gvar_x = jnp.sum(s_xx) / total - gm_x ** 2
        gvar_y = jnp.sum(s_yy) / total - gm_y ** 2
        gm_xy = jnp.sum(s_xy) / total
        pcc = (gm_xy - gm_x * gm_y) / jnp.sqrt(gvar_x * gvar_y + 1e-12)
    else:
        mean_x = s_x / n
        mean_y = s_y / n
        var_x = s_xx / n - mean_x ** 2
        var_y = s_yy / n - mean_y ** 2
        mean_xy = s_xy / n
        pcc = jnp.mean((mean_xy - mean_x * mean_y)
                       / jnp.sqrt(var_x * var_y + 1e-12))

    cc = jnp.where(jnp.sum(s_y) == 0, jnp.float32(0.5), 1.0 - pcc)
    loss = (loss_1 + cc_weight * cc) / (1.0 + cc_weight)
    return loss_1, cc, loss


def _reference(x, y, *, loss_1_type="l1", cc_weight=0.1, beta=0.05):
    """Pure-JAX mirror of the PyTorch module, for validation."""
    xf = x.astype(jnp.float32)
    yf = y.astype(jnp.float32)
    d = xf - yf
    if loss_1_type == "l1":
        l1 = jnp.mean(jnp.abs(d))
    elif loss_1_type == "l2":
        l1 = jnp.mean(d * d)
    else:
        ad = jnp.abs(d)
        l1 = jnp.mean(jnp.where(ad < beta, 0.5 * d * d / beta, ad - 0.5 * beta))

    B, C, H, W = x.shape
    if C == 1:
        xr = xf.reshape(1, -1)
        yr = yf.reshape(1, -1)
    else:
        xr = xf.reshape(B, -1)
        yr = yf.reshape(B, -1)
    mean_x = xr.mean(1)
    mean_y = yr.mean(1)
    var_x = (xr ** 2).mean(1) - mean_x ** 2
    var_y = (yr ** 2).mean(1) - mean_y ** 2
    mean_xy = (xr * yr).mean(1)
    pcc = jnp.mean((mean_xy - mean_x * mean_y) / jnp.sqrt(var_x * var_y + 1e-12))
    cc = jnp.where(jnp.sum(yf) == 0, jnp.float32(0.5), 1.0 - pcc)
    loss = (l1 + cc_weight * cc) / (1.0 + cc_weight)
    return l1, cc, loss


def _check(got, want, tag):
    for g, w in zip(got, want):
        g, w = float(g), float(w)
        assert abs(g - w) <= 1e-4 * max(1.0, abs(w)), (tag, g, w)


if __name__ == "__main__":
    key = jax.random.PRNGKey(0)
    kx, ky = jax.random.split(key)

    # Primary case: NCHW, divides cleanly.
    x = jax.random.normal(kx, (2, 4, 16, 16), dtype=jnp.float32)
    y = jax.random.normal(ky, (2, 4, 16, 16), dtype=jnp.float32)
    out = jax.block_until_ready(
        composite_loss(x, y, loss_1_type="l1", cc_weight=0.1, beta=0.05))
    ref = jax.block_until_ready(_reference(x, y, loss_1_type="l1"))
    _check(out, ref, "l1")

    # Ragged case: exercises the zero-pad path and smooth_l1.
    x2 = jax.random.normal(kx, (2, 3, 10, 10), dtype=jnp.float32)
    y2 = jax.random.normal(ky, (2, 3, 10, 10), dtype=jnp.float32)
    out2 = jax.block_until_ready(
        composite_loss(x2, y2, loss_1_type="smooth_l1", cc_weight=0.1, beta=0.05))
    ref2 = jax.block_until_ready(_reference(x2, y2, loss_1_type="smooth_l1"))
    _check(out2, ref2, "smooth_l1")

    print("KERNEL_OK")
</pallas_src>

<mosaic_0001>
module attributes {stable_mosaic.version = 11 : i64} {
  func.func @_stats_kernel(%arg0: i32, %arg1: i32, %arg2: memref<8x256xf32, #tpu.memory_space<vmem>>, %arg3: memref<8x256xf32, #tpu.memory_space<vmem>>, %arg4: memref<1x8x8xf32, #tpu.memory_space<vmem>>, %arg5: memref<6x8x256xf32, #tpu.memory_space<vmem>>) attributes {dimension_semantics = [#tpu.dimension_semantics<parallel>, #tpu.dimension_semantics<arbitrary>], iteration_bounds = array<i64: 1, 1>, scalar_prefetch = 0 : i64, scratch_operands = 1 : i64, tpu.core_type = #tpu.core_type<tc>, window_params = [{transform_indices = @transform_0, window_bounds = array<i64: 8, 256>}, {transform_indices = @transform_1, window_bounds = array<i64: 8, 256>}, {transform_indices = @transform_2, window_bounds = array<i64: 1, 8, 8>}]} {
    %c0_i32 = arith.constant 0 : i32
    %0 = arith.cmpi eq, %arg1, %c0_i32 : i32
    %1 = arith.extui %0 : i1 to i32
    %c0_i32_0 = arith.constant 0 : i32
    %2 = arith.cmpi ne, %1, %c0_i32_0 : i32
    scf.if %2 {
      %cst = arith.constant 0.000000e+00 : f32
      %49 = vector.broadcast %cst : f32 to vector<6x8x256xf32>
      %c0_37 = arith.constant 0 : index
      %c0_38 = arith.constant 0 : index
      %c0_39 = arith.constant 0 : index
      %50 = vector.load %arg5[%c0_37, %c0_38, %c0_39] : memref<6x8x256xf32, #tpu.memory_space<vmem>>, vector<6x8x256xf32>
      tpu.vector_store %arg5[%c0_37, %c0_38, %c0_39], %49 {strides = array<i32>} : memref<6x8x256xf32, #tpu.memory_space<vmem>>, vector<6x8x256xf32>,
    } else {
    }
    %c0 = arith.constant 0 : index
    %c0_1 = arith.constant 0 : index
    %3 = vector.load %arg2[%c0, %c0_1] : memref<8x256xf32, #tpu.memory_space<vmem>>, vector<8x256xf32>
    %c0_2 = arith.constant 0 : index
    %c0_3 = arith.constant 0 : index
    %4 = vector.load %arg3[%c0_2, %c0_3] : memref<8x256xf32, #tpu.memory_space<vmem>>, vector<8x256xf32>
    %5 = arith.subf %3, %4 : vector<8x256xf32>
    %6 = math.absf %5 : vector<8x256xf32>
    %c0_4 = arith.constant 0 : index
    %c0_5 = arith.constant 0 : index
    %c0_6 = arith.constant 0 : index
    %7 = vector.load %arg5[%c0_4, %c0_5, %c0_6] : memref<6x8x256xf32, #tpu.memory_space<vmem>>, vector<1x8x256xf32>
    %8 = vector.shape_cast %7 : vector<1x8x256xf32> to vector<8x256xf32>
    %9 = arith.addf %8, %6 : vector<8x256xf32>
    %c0_7 = arith.constant 0 : index
    %c0_8 = arith.constant 0 : index
    %c0_9 = arith.constant 0 : index
    %10 = vector.load %arg5[%c0_7, %c0_8, %c0_9] : memref<6x8x256xf32, #tpu.memory_space<vmem>>, vector<1x8x256xf32>
    %11 = vector.shape_cast %10 : vector<1x8x256xf32> to vector<8x256xf32>
    %12 = vector.shape_cast %9 : vector<8x256xf32> to vector<1x8x256xf32>
    tpu.vector_store %arg5[%c0_7, %c0_8, %c0_9], %12 {strides = array<i32>} : memref<6x8x256xf32, #tpu.memory_space<vmem>>, vector<1x8x256xf32>,
    %c1 = arith.constant 1 : index
    %c0_10 = arith.constant 0 : index
    %c0_11 = arith.constant 0 : index
    %13 = vector.load %arg5[%c1, %c0_10, %c0_11] : memref<6x8x256xf32, #tpu.memory_space<vmem>>, vector<1x8x256xf32>
    %14 = vector.shape_cast %13 : vector<1x8x256xf32> to vector<8x256xf32>
    %15 = arith.addf %14, %3 : vector<8x256xf32>
    %c1_12 = arith.constant 1 : index
    %c0_13 = arith.constant 0 : index
    %c0_14 = arith.constant 0 : index
    %16 = vector.load %arg5[%c1_12, %c0_13, %c0_14] : memref<6x8x256xf32, #tpu.memory_space<vmem>>, vector<1x8x256xf32>
    %17 = vector.shape_cast %16 : vector<1x8x256xf32> to vector<8x256xf32>
    %18 = vector.shape_cast %15 : vector<8x256xf32> to vector<1x8x256xf32>
    tpu.vector_store %arg5[%c1_12, %c0_13, %c0_14], %18 {strides = array<i32>} : memref<6x8x256xf32, #tpu.memory_space<vmem>>, vector<1x8x256xf32>,
    %c2 = arith.constant 2 : index
    %c0_15 = arith.constant 0 : index
    %c0_16 = arith.constant 0 : index
    %19 = vector.load %arg5[%c2, %c0_15, %c0_16] : memref<6x8x256xf32, #tpu.memory_space<vmem>>, vector<1x8x256xf32>
    %20 = vector.shape_cast %19 : vector<1x8x256xf32> to vector<8x256xf32>
    %21 = arith.addf %20, %4 : vector<8x256xf32>
    %c2_17 = arith.constant 2 : index
    %c0_18 = arith.constant 0 : index
    %c0_19 = arith.constant 0 : index
    %22 = vector.load %arg5[%c2_17, %c0_18, %c0_19] : memref<6x8x256xf32, #tpu.memory_space<vmem>>, vector<1x8x256xf32>
    %23 = vector.shape_cast %22 : vector<1x8x256xf32> to vector<8x256xf32>
    %24 = vector.shape_cast %21 : vector<8x256xf32> to vector<1x8x256xf32>
    tpu.vector_store %arg5[%c2_17, %c0_18, %c0_19], %24 {strides = array<i32>} : memref<6x8x256xf32, #tpu.memory_space<vmem>>, vector<1x8x256xf32>,
    %c3 = arith.constant 3 : index
    %c0_20 = arith.constant 0 : index
    %c0_21 = arith.constant 0 : index
    %25 = vector.load %arg5[%c3, %c0_20, %c0_21] : memref<6x8x256xf32, #tpu.memory_space<vmem>>, vector<1x8x256xf32>
    %26 = vector.shape_cast %25 : vector<1x8x256xf32> to vector<8x256xf32>
    %27 = arith.mulf %3, %3 : vector<8x256xf32>
    %28 = arith.addf %26, %27 : vector<8x256xf32>
    %c3_22 = arith.constant 3 : index
    %c0_23 = arith.constant 0 : index
    %c0_24 = arith.constant 0 : index
    %29 = vector.load %arg5[%c3_22, %c0_23, %c0_24] : memref<6x8x256xf32, #tpu.memory_space<vmem>>, vector<1x8x256xf32>
    %30 = vector.shape_cast %29 : vector<1x8x256xf32> to vector<8x256xf32>
    %31 = vector.shape_cast %28 : vector<8x256xf32> to vector<1x8x256xf32>
    tpu.vector_store %arg5[%c3_22, %c0_23, %c0_24], %31 {strides = array<i32>} : memref<6x8x256xf32, #tpu.memory_space<vmem>>, vector<1x8x256xf32>,
    %c4 = arith.constant 4 : index
    %c0_25 = arith.constant 0 : index
    %c0_26 = arith.constant 0 : index
    %32 = vector.load %arg5[%c4, %c0_25, %c0_26] : memref<6x8x256xf32, #tpu.memory_space<vmem>>, vector<1x8x256xf32>
    %33 = vector.shape_cast %32 : vector<1x8x256xf32> to vector<8x256xf32>
    %34 = arith.mulf %4, %4 : vector<8x256xf32>
    %35 = arith.addf %33, %34 : vector<8x256xf32>
    %c4_27 = arith.constant 4 : index
    %c0_28 = arith.constant 0 : index
    %c0_29 = arith.constant 0 : index
    %36 = vector.load %arg5[%c4_27, %c0_28, %c0_29] : memref<6x8x256xf32, #tpu.memory_space<vmem>>, vector<1x8x256xf32>
    %37 = vector.shape_cast %36 : vector<1x8x256xf32> to vector<8x256xf32>
    %38 = vector.shape_cast %35 : vector<8x256xf32> to vector<1x8x256xf32>
    tpu.vector_store %arg5[%c4_27, %c0_28, %c0_29], %38 {strides = array<i32>} : memref<6x8x256xf32, #tpu.memory_space<vmem>>, vector<1x8x256xf32>,
    %c5 = arith.constant 5 : index
    %c0_30 = arith.constant 0 : index
    %c0_31 = arith.constant 0 : index
    %39 = vector.load %arg5[%c5, %c0_30, %c0_31] : memref<6x8x256xf32, #tpu.memory_space<vmem>>, vector<1x8x256xf32>
    %40 = vector.shape_cast %39 : vector<1x8x256xf32> to vector<8x256xf32>
    %41 = arith.mulf %3, %4 : vector<8x256xf32>
    %42 = arith.addf %40, %41 : vector<8x256xf32>
    %c5_32 = arith.constant 5 : index
    %c0_33 = arith.constant 0 : index
    %c0_34 = arith.constant 0 : index
    %43 = vector.load %arg5[%c5_32, %c0_33, %c0_34] : memref<6x8x256xf32, #tpu.memory_space<vmem>>, vector<1x8x256xf32>
    %44 = vector.shape_cast %43 : vector<1x8x256xf32> to vector<8x256xf32>
    %45 = vector.shape_cast %42 : vector<8x256xf32> to vector<1x8x256xf32>
    tpu.vector_store %arg5[%c5_32, %c0_33, %c0_34], %45 {strides = array<i32>} : memref<6x8x256xf32, #tpu.memory_space<vmem>>, vector<1x8x256xf32>,
    %c0_i32_35 = arith.constant 0 : i32
    %46 = arith.cmpi eq, %arg1, %c0_i32_35 : i32
    %47 = arith.extui %46 : i1 to i32
    %c0_i32_36 = arith.constant 0 : i32
    %48 = arith.cmpi ne, %47, %c0_i32_36 : i32
    scf.if %48 {
      %c0_37 = arith.constant 0 : index
      %c0_38 = arith.constant 0 : index
      %c0_39 = arith.constant 0 : index
      %49 = vector.load %arg5[%c0_37, %c0_38, %c0_39] : memref<6x8x256xf32, #tpu.memory_space<vmem>>, vector<6x8x256xf32>
      %cst = arith.constant dense<0.000000e+00> : vector<6x8xf32>
      %50 = vector.multi_reduction <add>, %49, %cst [2] : vector<6x8x256xf32> to vector<6x8xf32>
      %cst_40 = arith.constant 0.000000e+00 : f32
      %51 = vector.broadcast %cst_40 : f32 to vector<2x8xf32>
      %52 = tpu.concatenate %50, %51 in 0 : vector<6x8xf32>, vector<2x8xf32> -> vector<8x8xf32>
      %c0_41 = arith.constant 0 : index
      %c0_42 = arith.constant 0 : index
      %c0_43 = arith.constant 0 : index
      %53 = vector.load %arg4[%c0_41, %c0_42, %c0_43] : memref<1x8x8xf32, #tpu.memory_space<vmem>>, vector<1x8x8xf32>
      %54 = vector.shape_cast %53 : vector<1x8x8xf32> to vector<8x8xf32>
      %55 = vector.shape_cast %52 : vector<8x8xf32> to vector<1x8x8xf32>
      tpu.vector_store %arg4[%c0_41, %c0_42, %c0_43], %55 {strides = array<i32>} : memref<1x8x8xf32, #tpu.memory_space<vmem>>, vector<1x8x8xf32>,
    } else {
    }
    return
  }
  func.func @transform_0(%arg0: i32, %arg1: i32) -> (i32, i32) {
    %c1_i32 = arith.constant 1 : i32
    %0 = arith.muli %arg0, %c1_i32 : i32
    %1 = arith.addi %0, %arg1 : i32
    %c0_i32 = arith.constant 0 : i32
    %c0_i32_0 = arith.constant 0 : i32
    return %c0_i32, %1 : i32, i32
  }
  func.func @transform_1(%arg0: i32, %arg1: i32) -> (i32, i32) {
    %c1_i32 = arith.constant 1 : i32
    %0 = arith.muli %arg0, %c1_i32 : i32
    %1 = arith.addi %0, %arg1 : i32
    %c0_i32 = arith.constant 0 : i32
    %c0_i32_0 = arith.constant 0 : i32
    return %c0_i32, %1 : i32, i32
  }
  func.func @transform_2(%arg0: i32, %arg1: i32) -> (i32, i32, i32) {
    %c0_i32 = arith.constant 0 : i32
    %c0_i32_0 = arith.constant 0 : i32
    %c0_i32_1 = arith.constant 0 : i32
    return %arg0, %c0_i32, %c0_i32_0 : i32, i32, i32
  }
}

</mosaic_0001>

<bundles_post_ra>
// kernel: tpu_custom_call.1
= control target key start
LH: loop header
LB: loop body
LE: loop exit
PB: predicated region body
PF: predicated region fallthrough
CT: control target
= control target key end

     0   :  { %7 = vsyncpa [#allocation4], 0  ;;  %s344_s0 = inlined_call_operand.hbm [shape: f32[8,256], index: 0, kind: input, shape index: {}]   ;;  %s345_s1 = inlined_call_operand.hbm [shape: f32[8,256], index: 1, kind: input, shape index: {}]   ;;  %s346_s2 = inlined_call_operand.hbm [shape: f32[1,8,8], index: 2, kind: output, shape index: {}]  }
   0x1   :  { %8 = vsyncpa [#allocation7], 0 }
   0x2   :  { %9 = vsyncpa [#allocation5], 0  ;;  %s290_s9 = smov [#allocation3]   ;;  %s291_s11 = smov [#allocation6]  }
   0x3   :  { %s20_s10 = sshll.u32 %s290_s9, 4  ;;  %s34_s12 = sshll.u32 %s291_s11, 4  ;;  %s21_s10 = int_to_ptr.vmem [resolvable:$true] %s20_s10  ;;  %s35_s12 = int_to_ptr.vmem [resolvable:$true] %s34_s12 }
   0x4   :  { %s218_s15 = scalar_lea.hbm %s344_s0, 256 }
   0x5   :  { %p219_p0 = scmp.ne.s32.totalorder %s344_s0, %s218_s15  ;;  %p222_p1 = scmp.lt.u32.totalorder %s218_s15, %s344_s0 }
   0x7   :  { %p224_p2 = pnand %p222_p1, %p219_p0 }
   0x9   :  { %227 = shalt.err (!%p224_p2)
}
   0xa   :  { %s228_s20 = scalar_lea.vmem %s21_s10, 256  ;;  %p233_p4 = scmp.lt.s32.totalorder %s21_s10, %s21_s10 }
   0xb   :  { %p229_p3 = scmp.ne.s32.totalorder %s21_s10, %s228_s20  ;;  %p234_p5 = scmp.lt.s32.totalorder %s228_s20, %s228_s20 }
   0xd   :  { %p235_p6 = por %p234_p5, %p233_p4 }
   0xf   :  { %p236_p7 = pnand %p235_p6, %p229_p3 }
  0x11   :  { %239 = shalt.err (!%p236_p7)
}
  0x12   :  { %23 = dma.hbm_to_vmem [thread:$0]  %s344_s0, 256, %s21_s10, [#allocation4]  }
  0x13   :  { %s240_s25 = scalar_lea.hbm %s345_s1, 256 }
  0x14   :  { %p241_p8 = scmp.ne.s32.totalorder %s345_s1, %s240_s25  ;;  %p244_p9 = scmp.lt.u32.totalorder %s240_s25, %s345_s1 }
  0x16   :  { %p246_p10 = pnand %p244_p9, %p241_p8 }
  0x18   :  { %249 = shalt.err (!%p246_p10)
}
  0x19   :  { %s250_s30 = scalar_lea.vmem %s35_s12, 256  ;;  %p255_p12 = scmp.lt.s32.totalorder %s35_s12, %s35_s12 }
  0x1a   :  { %p251_p11 = scmp.ne.s32.totalorder %s35_s12, %s250_s30  ;;  %p256_p13 = scmp.lt.s32.totalorder %s250_s30, %s250_s30 }
  0x1c   :  { %p257_p0 = por %p256_p13, %p255_p12 }
  0x1e   :  { %p258_p1 = pnand %p257_p0, %p251_p11 }
  0x20   :  { %261 = shalt.err (!%p258_p1)
}
  0x21   :  { %37 = dma.hbm_to_vmem [thread:$0]  %s345_s1, 256, %s35_s12, [#allocation7]  }
  0x22   :  { %284 = dma.done.wait [#allocation4], 256  }
  0x23   :  { %285 = vsyncadd [#allocation4], 4294967040 }
  0x24   :  { %286 = dma.done.wait [#allocation7], 256  }
  0x25   :  { %287 = vsyncadd [#allocation7], 4294967040  ;;  %v64_v0 = vld [vmem:[#allocation3] sm:$0xff]  ;;  %v65_v1 = vld [vmem:[#allocation3 + $0x8] sm:$0xff]  ;;  %v158_v20 = vlaneseq  ;;  %vm184_vm0 = vcmask 1041409   ;;  %vm186_vm1 = vcmask 1042434  }
  0x26   :  { %v66_v2 = vld [vmem:[#allocation6] sm:$0xff]  ;;  %v137_v3 = vadd.f32 %v65_v1, %v64_v0  ;;  %v67_v4 = vld [vmem:[#allocation6 + $0x8] sm:$0xff]  ;;  %v95_v6 = vmul.f32 %v64_v0, %v64_v0  ;;  %v96_v7 = vmul.f32 %v65_v1, %v65_v1  ;;  %vm188_vm2 = vcmask 1043459   ;;  %s292_s1 = smov [#allocation8]  }
  0x27   :  { %v68_v5 = vsub.f32 %v64_v0, %v66_v2  ;;  %v140_v8 = vadd.f32 %v67_v4, %v66_v2  ;;  %v69_v9 = vsub.f32 %v65_v1, %v67_v4  ;;  %v104_v11 = vmul.f32 %v66_v2, %v66_v2  ;;  %s205_s4 = sshll.u32 %s292_s1, 4  ;;  %s206_s4 = int_to_ptr.vmem [resolvable:$true] %s205_s4 }
  0x28   :  { %138 = vadd.xlane.f32.xlu0 %v137_v3  ;;  %v105_v12 = vmul.f32 %v67_v4, %v67_v4  ;;  %v143_v14 = vadd.f32 %v96_v7, %v95_v6  ;;  %v113_v15 = vmul.f32 %v66_v2, %v64_v0  ;;  %v114_v16 = vmul.f32 %v67_v4, %v65_v1  ;;  %s262_s5 = scalar_lea.vmem %s206_s4, 128  ;;  %p267_p3 = scmp.lt.s32.totalorder %s206_s4, %s206_s4 }
  0x29   :  { %v70_v10 = vand.u32 2147483647, %v68_v5  ;;  %141 = vadd.xlane.f32.xlu1 %v140_v8  ;;  %v71_v13 = vand.u32 2147483647, %v69_v9  ;;  %v159_v21 = vand.u32 127, %v158_v20  ;;  %v161_v22 = vshrl.u32 %v158_v20, 7  ;;  %p263_p2 = scmp.ne.s32.totalorder %s206_s4, %s262_s5  ;;  %p268_p4 = scmp.lt.s32.totalorder %s262_s5, %s262_s5 }
  0x2a   :  { %v146_v18 = vadd.f32 %v105_v12, %v104_v11  ;;  %v149_v19 = vadd.f32 %v114_v16, %v113_v15  ;;  %vm190_vm3 = vcmask 1044484   ;;  %vm192_vm4 = vcmask 1045509  }
  0x2b   :  { %v134_v17 = vadd.f32 %v71_v13, %v70_v10  ;;  %v162_v25 = vsub.s32 %v159_v21, %v161_v22  ;;  %vm195_vm5 = vcmask 1045504   ;;  %vm197_vm6 = vcmask 64512   ;;  %p269_p5 = por %p268_p4, %p267_p3 }
  0x2d   :  { %135 = vadd.xlane.f32.xlu0 %v134_v17  ;;  %144 = vadd.xlane.f32.xlu1 %v143_v14  ;;  %p270_p6 = pnand %p269_p5, %p263_p2 }
  0x31   :  { %147 = vadd.xlane.f32.xlu0 %v146_v18  ;;  %150 = vadd.xlane.f32.xlu1 %v149_v19 }
  0xb5   :  { %v139_v23 = vpop.xlane.xlu0 %138 }
  0xb6   :  { %v142_v24 = vpop.xlane.xlu1 %141  ;;  %v167_v28 = vrot.slane %v139_v23, %v162_v25 }
  0xb7   :  { %v171_v31 = vrot.slane %v142_v24, %v162_v25 }
  0xba   :  { %v136_v26 = vpop.xlane.xlu0 %135  ;;  %v145_v27 = vpop.xlane.xlu1 %144 }
  0xbb   :  { %v163_v29 = vrot.slane %v136_v26, %v162_v25  ;;  %v175_v30 = vrot.slane %v145_v27, %v162_v25 }
  0xbd   :  { %v185_v32 = vsel %vm184_vm0, %v167_v28, %v163_v29 }
  0xbe   :  { %v187_v33 = vsel %vm186_vm1, %v171_v31, %v185_v32  ;;  %v148_v34 = vpop.xlane.xlu0 %147  ;;  %v151_v35 = vpop.xlane.xlu1 %150 }
  0xbf   :  { %v189_v36 = vsel %vm188_vm2, %v175_v30, %v187_v33  ;;  %v179_v37 = vrot.slane %v148_v34, %v162_v25  ;;  %v183_v38 = vrot.slane %v151_v35, %v162_v25 }
  0xc1   :  { %v191_v39 = vsel %vm190_vm3, %v179_v37, %v189_v36 }
  0xc2   :  { %v193_v40 = vsel %vm192_vm4, %v183_v38, %v191_v39 }
  0xc3   :  { %v196_v41 = vsel %vm195_vm5, %v193_v40, 0.0 }
  0xc4   :  { %198 = vst.msk [vmem:[#allocation8] sm:$0xff] %vm197_vm6, %v196_v41 }
  0xc5   :  { %273 = shalt.err (!%p270_p6)
}
  0xc6   :  { %s274_s8 = scalar_lea.hbm %s346_s2, 128 }
  0xc7   :  { %p275_p7 = scmp.ne.s32.totalorder %s346_s2, %s274_s8  ;;  %p278_p8 = scmp.lt.u32.totalorder %s274_s8, %s346_s2 }
  0xc9   :  { %p280_p9 = pnand %p278_p8, %p275_p7 }
  0xcb   :  { %283 = shalt.err (!%p280_p9)
}
  0xcc   :  { %208 = dma.vmem_to_hbm [thread:$0]  %s206_s4, 128, %s346_s2, [#allocation5]  }
  0xcd   :  { %288 = dma.done.wait [#allocation5], 128  }
  0xce   :  { %289 = vsyncadd [#allocation5], 4294967168 }
  0xcf   :  { %212 = vsyncpa [#allocation4], 1 }
  0xd0   :  { %213 = vsyncpa [#allocation7], 1 }
  0xd1   :  { %214 = vsyncpa [#allocation5], 1 }

</bundles_post_ra>
